<compile_context>
chip_gen: v5e
topology: v5e:2x2
jax: 0.10.0
libtpu: 0.0.40
codegen_flags: <defaults>
</compile_context>

<pallas_src>
import math
import functools

import jax
import jax.numpy as jnp
from jax.experimental import pallas as pl
from jax.experimental.pallas import tpu as pltpu


# ----------------------------------------------------------------------------
# Stage A kernel: PFormer (once) + part_feat update + cformer row-i + fuse bias
# ----------------------------------------------------------------------------

def _stage_a_kernel(x_ref, wp_ref, bp_ref, pf_ref,
                    cf_wqkv_ref, cf_bqkv_ref, cf_wo_ref, cf_bo_ref,
                    fw2_ref, fb_ref,
                    h_ref, pc_ref, pf_out_ref,
                    *, part_idx, num_heads, T, P, H):
    dh = H // num_heads
    scale = 1.0 / math.sqrt(dh)

    # PFormer stand-in, shared across all T timesteps (station=True): one matmul.
    x = x_ref[...].astype(jnp.bfloat16)
    h = jnp.maximum(
        jnp.dot(x, wp_ref[...], preferred_element_type=jnp.float32) + bp_ref[...],
        0.0)                                                      # (N, H) f32
    h_ref[...] = h

    # part_feat[:, i, :] = mean(h over nodes)  (fused scatter; aliased output)
    hmean = jnp.mean(h, axis=0, keepdims=True)                    # (1, H)
    hmean3 = hmean.reshape(1, 1, H)
    pf_out_ref[...] = pf_ref[...]
    for t in range(T):
        pf_out_ref[t:t + 1, part_idx:part_idx + 1, :] = hmean3

    cf_wqkv = cf_wqkv_ref[...]                                    # (H, 3H) bf16
    cf_wo = cf_wo_ref[...]                                        # (H, H)  bf16
    cf_bqkv = cf_bqkv_ref[...]                                    # (1, 3H) f32
    fw2 = fw2_ref[...]                                            # (H, H)  bf16
    pf_upd = pf_out_ref[...]                                      # (T, P, H) f32

    # cformer self-attention over parts.  Only query row `part_idx` of part_emb
    # is consumed downstream, so only that query row is computed.
    for t in range(T):
        pf_t = pf_upd[t].astype(jnp.bfloat16)                     # (P, H)
        qkv = jnp.dot(pf_t, cf_wqkv,
                      preferred_element_type=jnp.float32) + cf_bqkv   # (P, 3H)
        q_i = qkv[part_idx:part_idx + 1, :H]                      # (1, H)
        k = qkv[:, H:2 * H]                                       # (P, H)
        v = qkv[:, 2 * H:]                                        # (P, H)
        o_t = jnp.zeros((1, H), jnp.float32)
        for hd in range(num_heads):
            sl = slice(hd * dh, (hd + 1) * dh)
            s = jnp.sum(q_i[:, sl] * k[:, sl], axis=-1,
                        keepdims=True) * scale                    # (P, 1)
            s = s - jnp.max(s, axis=0, keepdims=True)
            e = jnp.exp(s)
            inv = pl.reciprocal(jnp.sum(e, axis=0, keepdims=True), approx=True)
            ctx = jnp.sum((e * inv) * v[:, sl], axis=0,
                          keepdims=True)                          # (1, dh)
            o_t = o_t + jnp.dot(ctx.astype(jnp.bfloat16), cf_wo[sl, :],
                                preferred_element_type=jnp.float32)
        o_t = o_t + cf_bo_ref[...]                                # part_emb[t, i]
        # fuse correction: part_emb[t, i] @ W2 + b  (added to h@W1 in stage B)
        pc = jnp.dot(o_t.astype(jnp.bfloat16), fw2,
                     preferred_element_type=jnp.float32) + fb_ref[...]
        pc_ref[t:t + 1, :] = pc


def stage_a(x, part_feat, params, part_idx, num_heads):
    N, IN_C = x.shape
    T, P, H = part_feat.shape
    kern = functools.partial(_stage_a_kernel, part_idx=part_idx,
                             num_heads=num_heads, T=T, P=P, H=H)

    def full(shape):
        return pl.BlockSpec(shape, lambda i, _s=shape: (0,) * len(_s))

    return pl.pallas_call(
        kern,
        out_shape=(jax.ShapeDtypeStruct((N, H), jnp.float32),
                   jax.ShapeDtypeStruct((T, H), jnp.float32),
                   jax.ShapeDtypeStruct((T, P, H), jnp.float32)),
        grid=(1,),
        in_specs=[
            full((N, IN_C)),
            full((IN_C, H)), full((1, H)),
            full((T, P, H)),
            full((H, 3 * H)), full((1, 3 * H)), full((H, H)), full((1, H)),
            full((H, H)), full((1, H)),
        ],
        out_specs=(full((N, H)), full((T, H)), full((T, P, H))),
        input_output_aliases={3: 2},     # part_feat updated in place
    )(x, params["pformer_w"], params["pformer_b"], part_feat,
      params["cf_wqkv"], params["cf_bqkv"], params["cf_wo"], params["cf_bo"],
      params["fuse_w2"], params["fuse_b"])


# ----------------------------------------------------------------------------
# Stage B kernel: fuse + TFormer attention over time + time-mean + final linear
# ----------------------------------------------------------------------------

def _stage_b_kernel(h_ref, pc_ref, fw1_ref,
                    tf_wqkv_ref, tf_bqkv_ref, tf_wo_ref, tf_bo_ref,
                    lin_w_ref, lin_b_ref,
                    out_ref, *, num_heads, T, H):
    dh = H // num_heads
    scale = 1.0 / math.sqrt(dh)

    hb = h_ref[...]                                               # (BN, H) f32
    hw1 = jnp.dot(hb.astype(jnp.bfloat16), fw1_ref[...],
                  preferred_element_type=jnp.float32)             # (BN, H)
    tf_wqkv = tf_wqkv_ref[...]
    tf_bqkv = tf_bqkv_ref[...]
    tf_wo = tf_wo_ref[...]
    tf_bo = tf_bo_ref[...]

    # fused features + packed QKV per timestep (T static, fully unrolled)
    qs, ks, vs = [], [], []
    for t in range(T):
        c_t = pc_ref[t:t + 1, :]                                  # (1, H)
        f_t = jnp.maximum(hw1 + c_t, 0.0) + hb                    # (BN, H)
        qkv = jnp.dot(f_t.astype(jnp.bfloat16), tf_wqkv,
                      preferred_element_type=jnp.float32) + tf_bqkv
        qs.append(qkv[:, :H])
        ks.append(qkv[:, H:2 * H])
        vs.append(qkv[:, 2 * H:])

    BN = hb.shape[0]
    acc = jnp.zeros((BN, H), jnp.float32)
    for t1 in range(T):
        o_t = jnp.zeros((BN, H), jnp.float32)
        for hd in range(num_heads):
            sl = slice(hd * dh, (hd + 1) * dh)
            qh = qs[t1][:, sl]
            ss = [jnp.sum(qh * ks[t2][:, sl], axis=-1, keepdims=True) * scale
                  for t2 in range(T)]                             # T x (BN, 1)
            m = ss[0]
            for t2 in range(1, T):
                m = jnp.maximum(m, ss[t2])
            es = [jnp.exp(s - m) for s in ss]
            denom = es[0]
            for t2 in range(1, T):
                denom = denom + es[t2]
            inv = pl.reciprocal(denom, approx=True)
            ctx = (es[0] * inv) * vs[0][:, sl]
            for t2 in range(1, T):
                ctx = ctx + (es[t2] * inv) * vs[t2][:, sl]        # (BN, dh)
            o_t = o_t + jnp.dot(ctx.astype(jnp.bfloat16), tf_wo[sl, :],
                                preferred_element_type=jnp.float32)
        acc = acc + o_t + tf_bo                                   # TFormer out_t
    hmean = acc * (1.0 / T)                                       # mean over time

    out_ref[...] = jnp.dot(hmean.astype(jnp.bfloat16), lin_w_ref[...],
                           preferred_element_type=jnp.float32) + lin_b_ref[...]


def stage_b(h, part_c, params, num_heads, block_n=8):
    N, H = h.shape
    T = part_c.shape[0]
    C = params["lin_w"].shape[1]
    bn = block_n if (N % block_n == 0) else N
    kern = functools.partial(_stage_b_kernel, num_heads=num_heads, T=T, H=H)

    def full(shape):
        return pl.BlockSpec(shape, lambda n, _s=shape: (0,) * len(_s))

    return pl.pallas_call(
        kern,
        out_shape=jax.ShapeDtypeStruct((N, C), jnp.float32),
        grid=(N // bn,),
        in_specs=[
            pl.BlockSpec((bn, H), lambda n: (n, 0)),
            full((T, H)),
            full((H, H)),
            full((H, 3 * H)), full((1, 3 * H)), full((H, H)), full((1, H)),
            full((H, C)), full((1, C)),
        ],
        out_specs=pl.BlockSpec((bn, C), lambda n: (n, 0)),
        compiler_params=pltpu.CompilerParams(
            dimension_semantics=("parallel",)),
    )(h, part_c, params["fuse_w1"],
      params["tf_wqkv"], params["tf_bqkv"], params["tf_wo"], params["tf_bo"],
      params["lin_w"], params["lin_b"])


# ----------------------------------------------------------------------------
# Parameter construction (deterministic, synthetic; weights stored bf16)
# ----------------------------------------------------------------------------

def _dense(key, fan_in, fan_out):
    kw, kb = jax.random.split(key)
    lim = 1.0 / math.sqrt(fan_in)
    w = jax.random.uniform(kw, (fan_in, fan_out), jnp.float32, -lim, lim)
    b = jax.random.uniform(kb, (1, fan_out), jnp.float32, -lim, lim)
    return w, b


def make_params(key, in_channels, hidden, out_channels, num_heads):
    assert hidden % num_heads == 0
    keys = jax.random.split(key, 12)
    p = {}
    wp, bp = _dense(keys[0], in_channels, hidden)
    p["pformer_w"], p["pformer_b"] = wp.astype(jnp.bfloat16), bp

    def mha(ks):
        wq, bq = _dense(ks[0], hidden, hidden)
        wk, bk = _dense(ks[1], hidden, hidden)
        wv, bv = _dense(ks[2], hidden, hidden)
        wo, bo = _dense(ks[3], hidden, hidden)
        wqkv = jnp.concatenate([wq, wk, wv], axis=1).astype(jnp.bfloat16)
        bqkv = jnp.concatenate([bq, bk, bv], axis=1)
        return wqkv, bqkv, wo.astype(jnp.bfloat16), bo

    p["cf_wqkv"], p["cf_bqkv"], p["cf_wo"], p["cf_bo"] = mha(keys[1:5])
    p["tf_wqkv"], p["tf_bqkv"], p["tf_wo"], p["tf_bo"] = mha(keys[5:9])
    fw, fb = _dense(keys[9], 2 * hidden, hidden)
    p["fuse_w1"] = fw[:hidden].astype(jnp.bfloat16)   # split: z@W = h@W1 + p@W2
    p["fuse_w2"] = fw[hidden:].astype(jnp.bfloat16)
    p["fuse_b"] = fb
    lw, lb = _dense(keys[10], hidden, out_channels)
    p["lin_w"], p["lin_b"] = lw.astype(jnp.bfloat16), lb
    p["num_heads"] = num_heads
    return p


# ----------------------------------------------------------------------------
# TGTOD forward (station=True, use_cformer=True)
# ----------------------------------------------------------------------------

def tgtod_forward(x, edge_index_list, i, params, part_feat):
    """x: (N, in_channels); edge_index_list: list of T edge indices (unused by
    the PFormer stand-in); i: current partition index (static int).
    Returns ((N, out_channels) logits, updated part_feat)."""
    T = len(edge_index_list)
    assert part_feat.shape[0] == T
    num_heads = params["num_heads"]
    # self.te(h, arange(T)) is discarded in the reference forward -> no-op.
    h, part_c, part_feat = stage_a(x, part_feat, params, i, num_heads)
    out = stage_b(h, part_c, params, num_heads)
    return out, part_feat


# ----------------------------------------------------------------------------
# Driver
# ----------------------------------------------------------------------------

if __name__ == "__main__":
    key = jax.random.PRNGKey(0)
    k_x, k_p, k_pf = jax.random.split(key, 3)

    N = 16              # number of nodes
    IN_C = 8            # in_channels
    HID = 32            # hidden_channels
    OUT_C = 4           # out_channels
    T = 4               # time steps (len(edge_index))
    NUM_PARTS = 4
    NUM_HEADS = 1       # trans_num_heads
    part_idx = 1        # i

    x = jax.random.normal(k_x, (N, IN_C), jnp.float32)
    edge_index = [jnp.zeros((2, 8), jnp.int32) for _ in range(T)]  # unused (stand-in)
    params = make_params(k_p, IN_C, HID, OUT_C, NUM_HEADS)
    # part_feat = torch.randn(T, num_parts, hidden) in the reference.
    part_feat = jax.random.normal(k_pf, (T, NUM_PARTS, HID), jnp.float32)

    out, part_feat = tgtod_forward(x, edge_index, part_idx, params, part_feat)
    out = jax.block_until_ready(out)
    part_feat = jax.block_until_ready(part_feat)

    assert out.shape == (N, OUT_C)
    assert part_feat.shape == (T, NUM_PARTS, HID)
    assert jnp.all(jnp.isfinite(out))
    assert jnp.all(jnp.isfinite(part_feat))
    print("KERNEL_OK")
</pallas_src>

<mosaic_0001>
module attributes {stable_mosaic.version = 11 : i64} {
  func.func @_stage_a_kernel(%arg0: i32, %arg1: memref<16x8xf32, #tpu.memory_space<vmem>>, %arg2: memref<8x32xbf16, #tpu.memory_space<vmem>>, %arg3: memref<1x32xf32, #tpu.memory_space<vmem>>, %arg4: memref<4x4x32xf32, #tpu.memory_space<vmem>>, %arg5: memref<32x96xbf16, #tpu.memory_space<vmem>>, %arg6: memref<1x96xf32, #tpu.memory_space<vmem>>, %arg7: memref<32x32xbf16, #tpu.memory_space<vmem>>, %arg8: memref<1x32xf32, #tpu.memory_space<vmem>>, %arg9: memref<32x32xbf16, #tpu.memory_space<vmem>>, %arg10: memref<1x32xf32, #tpu.memory_space<vmem>>, %arg11: memref<16x32xf32, #tpu.memory_space<vmem>>, %arg12: memref<4x32xf32, #tpu.memory_space<vmem>>, %arg13: memref<4x4x32xf32, #tpu.memory_space<vmem>>) attributes {dimension_semantics = [#tpu.dimension_semantics<arbitrary>], iteration_bounds = array<i64: 1>, scalar_prefetch = 0 : i64, scratch_operands = 0 : i64, tpu.core_type = #tpu.core_type<tc>, window_params = [{pipeline_mode = #tpu.pipeline_mode<synchronous>, transform_indices = @transform_0, window_bounds = array<i64: 16, 8>}, {pipeline_mode = #tpu.pipeline_mode<synchronous>, transform_indices = @transform_1, window_bounds = array<i64: 8, 32>}, {pipeline_mode = #tpu.pipeline_mode<synchronous>, transform_indices = @transform_2, window_bounds = array<i64: 1, 32>}, {pipeline_mode = #tpu.pipeline_mode<synchronous>, transform_indices = @transform_3, window_bounds = array<i64: 4, 4, 32>}, {pipeline_mode = #tpu.pipeline_mode<synchronous>, transform_indices = @transform_4, window_bounds = array<i64: 32, 96>}, {pipeline_mode = #tpu.pipeline_mode<synchronous>, transform_indices = @transform_5, window_bounds = array<i64: 1, 96>}, {pipeline_mode = #tpu.pipeline_mode<synchronous>, transform_indices = @transform_6, window_bounds = array<i64: 32, 32>}, {pipeline_mode = #tpu.pipeline_mode<synchronous>, transform_indices = @transform_7, window_bounds = array<i64: 1, 32>}, {pipeline_mode = #tpu.pipeline_mode<synchronous>, transform_indices = @transform_8, window_bounds = array<i64: 32, 32>}, {pipeline_mode = #tpu.pipeline_mode<synchronous>, transform_indices = @transform_9, window_bounds = array<i64: 1, 32>}, {pipeline_mode = #tpu.pipeline_mode<synchronous>, transform_indices = @transform_10, window_bounds = array<i64: 16, 32>}, {pipeline_mode = #tpu.pipeline_mode<synchronous>, transform_indices = @transform_11, window_bounds = array<i64: 4, 32>}, {pipeline_mode = #tpu.pipeline_mode<synchronous>, transform_indices = @transform_12, window_bounds = array<i64: 4, 4, 32>}]} {
    %c0 = arith.constant 0 : index
    %c0_0 = arith.constant 0 : index
    %0 = vector.load %arg1[%c0, %c0_0] : memref<16x8xf32, #tpu.memory_space<vmem>>, vector<16x8xf32>
    %1 = arith.truncf %0 : vector<16x8xf32> to vector<16x8xbf16>
    %c0_1 = arith.constant 0 : index
    %c0_2 = arith.constant 0 : index
    %2 = vector.load %arg2[%c0_1, %c0_2] : memref<8x32xbf16, #tpu.memory_space<vmem>>, vector<8x32xbf16>
    %cst = arith.constant dense<0.000000e+00> : vector<16x32xf32>
    %3 = tpu.matmul %1, %2, %cst {dimension_numbers = #tpu.dot_dimension_numbers<[1], [0], [0], [1], [0, 0, 1, 1], [], []>} : vector<16x8xbf16>, vector<8x32xbf16>, vector<16x32xf32> -> vector<16x32xf32>
    %c0_3 = arith.constant 0 : index
    %c0_4 = arith.constant 0 : index
    %4 = vector.load %arg3[%c0_3, %c0_4] : memref<1x32xf32, #tpu.memory_space<vmem>>, vector<1x32xf32>
    %5 = vector.broadcast %4 : vector<1x32xf32> to vector<16x32xf32>
    %6 = arith.addf %3, %5 : vector<16x32xf32>
    %cst_5 = arith.constant 0.000000e+00 : f32
    %7 = vector.broadcast %cst_5 : f32 to vector<16x32xf32>
    %8 = arith.maximumf %6, %7 : vector<16x32xf32>
    %c0_6 = arith.constant 0 : index
    %c0_7 = arith.constant 0 : index
    %9 = vector.load %arg11[%c0_6, %c0_7] : memref<16x32xf32, #tpu.memory_space<vmem>>, vector<16x32xf32>
    tpu.vector_store %arg11[%c0_6, %c0_7], %8 {strides = array<i32>} : memref<16x32xf32, #tpu.memory_space<vmem>>, vector<16x32xf32>,
    %cst_8 = arith.constant dense<0.000000e+00> : vector<32xf32>
    %10 = vector.multi_reduction <add>, %8, %cst_8 [0] : vector<16x32xf32> to vector<32xf32>
    %11 = vector.shape_cast %10 : vector<32xf32> to vector<1x32xf32>
    %cst_9 = arith.constant 1.600000e+01 : f32
    %12 = vector.broadcast %cst_9 : f32 to vector<1x32xf32>
    %13 = arith.divf %11, %12 : vector<1x32xf32>
    %14 = vector.shape_cast %13 : vector<1x32xf32> to vector<1x1x32xf32>
    %c0_10 = arith.constant 0 : index
    %c0_11 = arith.constant 0 : index
    %c0_12 = arith.constant 0 : index
    %15 = vector.load %arg4[%c0_10, %c0_11, %c0_12] : memref<4x4x32xf32, #tpu.memory_space<vmem>>, vector<4x4x32xf32>
    %c0_13 = arith.constant 0 : index
    %c0_14 = arith.constant 0 : index
    %c0_15 = arith.constant 0 : index
    %16 = vector.load %arg13[%c0_13, %c0_14, %c0_15] : memref<4x4x32xf32, #tpu.memory_space<vmem>>, vector<4x4x32xf32>
    tpu.vector_store %arg13[%c0_13, %c0_14, %c0_15], %15 {strides = array<i32>} : memref<4x4x32xf32, #tpu.memory_space<vmem>>, vector<4x4x32xf32>,
    %c0_16 = arith.constant 0 : index
    %c1 = arith.constant 1 : index
    %c0_17 = arith.constant 0 : index
    %17 = vector.load %arg13[%c0_16, %c1, %c0_17] : memref<4x4x32xf32, #tpu.memory_space<vmem>>, vector<1x1x32xf32>
    tpu.vector_store %arg13[%c0_16, %c1, %c0_17], %14 {strides = array<i32>} : memref<4x4x32xf32, #tpu.memory_space<vmem>>, vector<1x1x32xf32>,
    %c1_18 = arith.constant 1 : index
    %c1_19 = arith.constant 1 : index
    %c0_20 = arith.constant 0 : index
    %18 = vector.load %arg13[%c1_18, %c1_19, %c0_20] : memref<4x4x32xf32, #tpu.memory_space<vmem>>, vector<1x1x32xf32>
    tpu.vector_store %arg13[%c1_18, %c1_19, %c0_20], %14 {strides = array<i32>} : memref<4x4x32xf32, #tpu.memory_space<vmem>>, vector<1x1x32xf32>,
    %c2 = arith.constant 2 : index
    %c1_21 = arith.constant 1 : index
    %c0_22 = arith.constant 0 : index
    %19 = vector.load %arg13[%c2, %c1_21, %c0_22] : memref<4x4x32xf32, #tpu.memory_space<vmem>>, vector<1x1x32xf32>
    tpu.vector_store %arg13[%c2, %c1_21, %c0_22], %14 {strides = array<i32>} : memref<4x4x32xf32, #tpu.memory_space<vmem>>, vector<1x1x32xf32>,
    %c3 = arith.constant 3 : index
    %c1_23 = arith.constant 1 : index
    %c0_24 = arith.constant 0 : index
    %20 = vector.load %arg13[%c3, %c1_23, %c0_24] : memref<4x4x32xf32, #tpu.memory_space<vmem>>, vector<1x1x32xf32>
    tpu.vector_store %arg13[%c3, %c1_23, %c0_24], %14 {strides = array<i32>} : memref<4x4x32xf32, #tpu.memory_space<vmem>>, vector<1x1x32xf32>,
    %c0_25 = arith.constant 0 : index
    %c0_26 = arith.constant 0 : index
    %21 = vector.load %arg5[%c0_25, %c0_26] : memref<32x96xbf16, #tpu.memory_space<vmem>>, vector<32x96xbf16>
    %c0_27 = arith.constant 0 : index
    %c0_28 = arith.constant 0 : index
    %22 = vector.load %arg7[%c0_27, %c0_28] : memref<32x32xbf16, #tpu.memory_space<vmem>>, vector<32x32xbf16>
    %c0_29 = arith.constant 0 : index
    %c0_30 = arith.constant 0 : index
    %23 = vector.load %arg6[%c0_29, %c0_30] : memref<1x96xf32, #tpu.memory_space<vmem>>, vector<1x96xf32>
    %c0_31 = arith.constant 0 : index
    %c0_32 = arith.constant 0 : index
    %24 = vector.load %arg9[%c0_31, %c0_32] : memref<32x32xbf16, #tpu.memory_space<vmem>>, vector<32x32xbf16>
    %c0_33 = arith.constant 0 : index
    %c0_34 = arith.constant 0 : index
    %c0_35 = arith.constant 0 : index
    %25 = vector.load %arg13[%c0_33, %c0_34, %c0_35] : memref<4x4x32xf32, #tpu.memory_space<vmem>>, vector<4x4x32xf32>
    %26 = vector.extract_strided_slice %25 {offsets = [0, 0, 0], sizes = [1, 4, 32], strides = [1, 1, 1]} : vector<4x4x32xf32> to vector<1x4x32xf32>
    %27 = vector.shape_cast %26 : vector<1x4x32xf32> to vector<4x32xf32>
    %28 = arith.truncf %27 : vector<4x32xf32> to vector<4x32xbf16>
    %cst_36 = arith.constant dense<0.000000e+00> : vector<4x96xf32>
    %29 = tpu.matmul %28, %21, %cst_36 {dimension_numbers = #tpu.dot_dimension_numbers<[1], [0], [0], [1], [0, 0, 1, 1], [], []>} : vector<4x32xbf16>, vector<32x96xbf16>, vector<4x96xf32> -> vector<4x96xf32>
    %30 = vector.broadcast %23 : vector<1x96xf32> to vector<4x96xf32>
    %31 = arith.addf %29, %30 : vector<4x96xf32>
    %32 = vector.extract_strided_slice %31 {offsets = [1, 0], sizes = [1, 32], strides = [1, 1]} : vector<4x96xf32> to vector<1x32xf32>
    %33 = vector.extract_strided_slice %31 {offsets = [0, 32], sizes = [4, 32], strides = [1, 1]} : vector<4x96xf32> to vector<4x32xf32>
    %34 = vector.extract_strided_slice %31 {offsets = [0, 64], sizes = [4, 32], strides = [1, 1]} : vector<4x96xf32> to vector<4x32xf32>
    %cst_37 = arith.constant 0.000000e+00 : f32
    %35 = vector.broadcast %cst_37 : f32 to vector<1x32xf32>
    %36 = vector.broadcast %32 : vector<1x32xf32> to vector<4x32xf32>
    %37 = arith.mulf %36, %33 : vector<4x32xf32>
    %cst_38 = arith.constant dense<0.000000e+00> : vector<4xf32>
    %38 = vector.multi_reduction <add>, %37, %cst_38 [1] : vector<4x32xf32> to vector<4xf32>
    %39 = vector.shape_cast %38 : vector<4xf32> to vector<4x1xf32>
    %cst_39 = arith.constant 0.176776692 : f32
    %40 = vector.broadcast %cst_39 : f32 to vector<4x1xf32>
    %41 = arith.mulf %39, %40 : vector<4x1xf32>
    %cst_40 = arith.constant dense<0xFF800000> : vector<1xf32>
    %42 = vector.multi_reduction <maximumf>, %41, %cst_40 [0] : vector<4x1xf32> to vector<1xf32>
    %43 = vector.shape_cast %42 : vector<1xf32> to vector<1x1xf32>
    %44 = vector.broadcast %43 : vector<1x1xf32> to vector<4x1xf32>
    %45 = arith.subf %41, %44 : vector<4x1xf32>
    %46 = math.exp %45 : vector<4x1xf32>
    %cst_41 = arith.constant dense<0.000000e+00> : vector<1xf32>
    %47 = vector.multi_reduction <add>, %46, %cst_41 [0] : vector<4x1xf32> to vector<1xf32>
    %48 = vector.shape_cast %47 : vector<1xf32> to vector<1x1xf32>
    %49 = tpu.reciprocal %48 {approx = true} : vector<1x1xf32> -> vector<1x1xf32>
    %50 = vector.broadcast %49 : vector<1x1xf32> to vector<4x1xf32>
    %51 = arith.mulf %46, %50 : vector<4x1xf32>
    %52 = vector.broadcast %51 : vector<4x1xf32> to vector<4x32xf32>
    %53 = arith.mulf %52, %34 : vector<4x32xf32>
    %cst_42 = arith.constant dense<0.000000e+00> : vector<32xf32>
    %54 = vector.multi_reduction <add>, %53, %cst_42 [0] : vector<4x32xf32> to vector<32xf32>
    %55 = vector.shape_cast %54 : vector<32xf32> to vector<1x32xf32>
    %56 = arith.truncf %55 : vector<1x32xf32> to vector<1x32xbf16>
    %cst_43 = arith.constant dense<0.000000e+00> : vector<1x32xf32>
    %57 = tpu.matmul %56, %22, %cst_43 {dimension_numbers = #tpu.dot_dimension_numbers<[1], [0], [0], [1], [0, 0, 1, 1], [], []>} : vector<1x32xbf16>, vector<32x32xbf16>, vector<1x32xf32> -> vector<1x32xf32>
    %58 = arith.addf %35, %57 : vector<1x32xf32>
    %c0_44 = arith.constant 0 : index
    %c0_45 = arith.constant 0 : index
    %59 = vector.load %arg8[%c0_44, %c0_45] : memref<1x32xf32, #tpu.memory_space<vmem>>, vector<1x32xf32>
    %60 = arith.addf %58, %59 : vector<1x32xf32>
    %61 = arith.truncf %60 : vector<1x32xf32> to vector<1x32xbf16>
    %cst_46 = arith.constant dense<0.000000e+00> : vector<1x32xf32>
    %62 = tpu.matmul %61, %24, %cst_46 {dimension_numbers = #tpu.dot_dimension_numbers<[1], [0], [0], [1], [0, 0, 1, 1], [], []>} : vector<1x32xbf16>, vector<32x32xbf16>, vector<1x32xf32> -> vector<1x32xf32>
    %c0_47 = arith.constant 0 : index
    %c0_48 = arith.constant 0 : index
    %63 = vector.load %arg10[%c0_47, %c0_48] : memref<1x32xf32, #tpu.memory_space<vmem>>, vector<1x32xf32>
    %64 = arith.addf %62, %63 : vector<1x32xf32>
    %c0_49 = arith.constant 0 : index
    %c0_50 = arith.constant 0 : index
    %65 = vector.load %arg12[%c0_49, %c0_50] : memref<4x32xf32, #tpu.memory_space<vmem>>, vector<1x32xf32>
    tpu.vector_store %arg12[%c0_49, %c0_50], %64 {strides = array<i32>} : memref<4x32xf32, #tpu.memory_space<vmem>>, vector<1x32xf32>,
    %66 = vector.extract_strided_slice %25 {offsets = [1, 0, 0], sizes = [1, 4, 32], strides = [1, 1, 1]} : vector<4x4x32xf32> to vector<1x4x32xf32>
    %67 = vector.shape_cast %66 : vector<1x4x32xf32> to vector<4x32xf32>
    %68 = arith.truncf %67 : vector<4x32xf32> to vector<4x32xbf16>
    %cst_51 = arith.constant dense<0.000000e+00> : vector<4x96xf32>
    %69 = tpu.matmul %68, %21, %cst_51 {dimension_numbers = #tpu.dot_dimension_numbers<[1], [0], [0], [1], [0, 0, 1, 1], [], []>} : vector<4x32xbf16>, vector<32x96xbf16>, vector<4x96xf32> -> vector<4x96xf32>
    %70 = vector.broadcast %23 : vector<1x96xf32> to vector<4x96xf32>
    %71 = arith.addf %69, %70 : vector<4x96xf32>
    %72 = vector.extract_strided_slice %71 {offsets = [1, 0], sizes = [1, 32], strides = [1, 1]} : vector<4x96xf32> to vector<1x32xf32>
    %73 = vector.extract_strided_slice %71 {offsets = [0, 32], sizes = [4, 32], strides = [1, 1]} : vector<4x96xf32> to vector<4x32xf32>
    %74 = vector.extract_strided_slice %71 {offsets = [0, 64], sizes = [4, 32], strides = [1, 1]} : vector<4x96xf32> to vector<4x32xf32>
    %cst_52 = arith.constant 0.000000e+00 : f32
    %75 = vector.broadcast %cst_52 : f32 to vector<1x32xf32>
    %76 = vector.broadcast %72 : vector<1x32xf32> to vector<4x32xf32>
    %77 = arith.mulf %76, %73 : vector<4x32xf32>
    %cst_53 = arith.constant dense<0.000000e+00> : vector<4xf32>
    %78 = vector.multi_reduction <add>, %77, %cst_53 [1] : vector<4x32xf32> to vector<4xf32>
    %79 = vector.shape_cast %78 : vector<4xf32> to vector<4x1xf32>
    %cst_54 = arith.constant 0.176776692 : f32
    %80 = vector.broadcast %cst_54 : f32 to vector<4x1xf32>
    %81 = arith.mulf %79, %80 : vector<4x1xf32>
    %cst_55 = arith.constant dense<0xFF800000> : vector<1xf32>
    %82 = vector.multi_reduction <maximumf>, %81, %cst_55 [0] : vector<4x1xf32> to vector<1xf32>
    %83 = vector.shape_cast %82 : vector<1xf32> to vector<1x1xf32>
    %84 = vector.broadcast %83 : vector<1x1xf32> to vector<4x1xf32>
    %85 = arith.subf %81, %84 : vector<4x1xf32>
    %86 = math.exp %85 : vector<4x1xf32>
    %cst_56 = arith.constant dense<0.000000e+00> : vector<1xf32>
    %87 = vector.multi_reduction <add>, %86, %cst_56 [0] : vector<4x1xf32> to vector<1xf32>
    %88 = vector.shape_cast %87 : vector<1xf32> to vector<1x1xf32>
    %89 = tpu.reciprocal %88 {approx = true} : vector<1x1xf32> -> vector<1x1xf32>
    %90 = vector.broadcast %89 : vector<1x1xf32> to vector<4x1xf32>
    %91 = arith.mulf %86, %90 : vector<4x1xf32>
    %92 = vector.broadcast %91 : vector<4x1xf32> to vector<4x32xf32>
    %93 = arith.mulf %92, %74 : vector<4x32xf32>
    %cst_57 = arith.constant dense<0.000000e+00> : vector<32xf32>
    %94 = vector.multi_reduction <add>, %93, %cst_57 [0] : vector<4x32xf32> to vector<32xf32>
    %95 = vector.shape_cast %94 : vector<32xf32> to vector<1x32xf32>
    %96 = arith.truncf %95 : vector<1x32xf32> to vector<1x32xbf16>
    %cst_58 = arith.constant dense<0.000000e+00> : vector<1x32xf32>
    %97 = tpu.matmul %96, %22, %cst_58 {dimension_numbers = #tpu.dot_dimension_numbers<[1], [0], [0], [1], [0, 0, 1, 1], [], []>} : vector<1x32xbf16>, vector<32x32xbf16>, vector<1x32xf32> -> vector<1x32xf32>
    %98 = arith.addf %75, %97 : vector<1x32xf32>
    %c0_59 = arith.constant 0 : index
    %c0_60 = arith.constant 0 : index
    %99 = vector.load %arg8[%c0_59, %c0_60] : memref<1x32xf32, #tpu.memory_space<vmem>>, vector<1x32xf32>
    %100 = arith.addf %98, %99 : vector<1x32xf32>
    %101 = arith.truncf %100 : vector<1x32xf32> to vector<1x32xbf16>
    %cst_61 = arith.constant dense<0.000000e+00> : vector<1x32xf32>
    %102 = tpu.matmul %101, %24, %cst_61 {dimension_numbers = #tpu.dot_dimension_numbers<[1], [0], [0], [1], [0, 0, 1, 1], [], []>} : vector<1x32xbf16>, vector<32x32xbf16>, vector<1x32xf32> -> vector<1x32xf32>
    %c0_62 = arith.constant 0 : index
    %c0_63 = arith.constant 0 : index
    %103 = vector.load %arg10[%c0_62, %c0_63] : memref<1x32xf32, #tpu.memory_space<vmem>>, vector<1x32xf32>
    %104 = arith.addf %102, %103 : vector<1x32xf32>
    %c1_64 = arith.constant 1 : index
    %c0_65 = arith.constant 0 : index
    %105 = vector.load %arg12[%c1_64, %c0_65] : memref<4x32xf32, #tpu.memory_space<vmem>>, vector<1x32xf32>
    tpu.vector_store %arg12[%c1_64, %c0_65], %104 {strides = array<i32>} : memref<4x32xf32, #tpu.memory_space<vmem>>, vector<1x32xf32>,
    %106 = vector.extract_strided_slice %25 {offsets = [2, 0, 0], sizes = [1, 4, 32], strides = [1, 1, 1]} : vector<4x4x32xf32> to vector<1x4x32xf32>
    %107 = vector.shape_cast %106 : vector<1x4x32xf32> to vector<4x32xf32>
    %108 = arith.truncf %107 : vector<4x32xf32> to vector<4x32xbf16>
    %cst_66 = arith.constant dense<0.000000e+00> : vector<4x96xf32>
    %109 = tpu.matmul %108, %21, %cst_66 {dimension_numbers = #tpu.dot_dimension_numbers<[1], [0], [0], [1], [0, 0, 1, 1], [], []>} : vector<4x32xbf16>, vector<32x96xbf16>, vector<4x96xf32> -> vector<4x96xf32>
    %110 = vector.broadcast %23 : vector<1x96xf32> to vector<4x96xf32>
    %111 = arith.addf %109, %110 : vector<4x96xf32>
    %112 = vector.extract_strided_slice %111 {offsets = [1, 0], sizes = [1, 32], strides = [1, 1]} : vector<4x96xf32> to vector<1x32xf32>
    %113 = vector.extract_strided_slice %111 {offsets = [0, 32], sizes = [4, 32], strides = [1, 1]} : vector<4x96xf32> to vector<4x32xf32>
    %114 = vector.extract_strided_slice %111 {offsets = [0, 64], sizes = [4, 32], strides = [1, 1]} : vector<4x96xf32> to vector<4x32xf32>
    %cst_67 = arith.constant 0.000000e+00 : f32
    %115 = vector.broadcast %cst_67 : f32 to vector<1x32xf32>
    %116 = vector.broadcast %112 : vector<1x32xf32> to vector<4x32xf32>
    %117 = arith.mulf %116, %113 : vector<4x32xf32>
    %cst_68 = arith.constant dense<0.000000e+00> : vector<4xf32>
    %118 = vector.multi_reduction <add>, %117, %cst_68 [1] : vector<4x32xf32> to vector<4xf32>
    %119 = vector.shape_cast %118 : vector<4xf32> to vector<4x1xf32>
    %cst_69 = arith.constant 0.176776692 : f32
    %120 = vector.broadcast %cst_69 : f32 to vector<4x1xf32>
    %121 = arith.mulf %119, %120 : vector<4x1xf32>
    %cst_70 = arith.constant dense<0xFF800000> : vector<1xf32>
    %122 = vector.multi_reduction <maximumf>, %121, %cst_70 [0] : vector<4x1xf32> to vector<1xf32>
    %123 = vector.shape_cast %122 : vector<1xf32> to vector<1x1xf32>
    %124 = vector.broadcast %123 : vector<1x1xf32> to vector<4x1xf32>
    %125 = arith.subf %121, %124 : vector<4x1xf32>
    %126 = math.exp %125 : vector<4x1xf32>
    %cst_71 = arith.constant dense<0.000000e+00> : vector<1xf32>
    %127 = vector.multi_reduction <add>, %126, %cst_71 [0] : vector<4x1xf32> to vector<1xf32>
    %128 = vector.shape_cast %127 : vector<1xf32> to vector<1x1xf32>
    %129 = tpu.reciprocal %128 {approx = true} : vector<1x1xf32> -> vector<1x1xf32>
    %130 = vector.broadcast %129 : vector<1x1xf32> to vector<4x1xf32>
    %131 = arith.mulf %126, %130 : vector<4x1xf32>
    %132 = vector.broadcast %131 : vector<4x1xf32> to vector<4x32xf32>
    %133 = arith.mulf %132, %114 : vector<4x32xf32>
    %cst_72 = arith.constant dense<0.000000e+00> : vector<32xf32>
    %134 = vector.multi_reduction <add>, %133, %cst_72 [0] : vector<4x32xf32> to vector<32xf32>
    %135 = vector.shape_cast %134 : vector<32xf32> to vector<1x32xf32>
    %136 = arith.truncf %135 : vector<1x32xf32> to vector<1x32xbf16>
    %cst_73 = arith.constant dense<0.000000e+00> : vector<1x32xf32>
    %137 = tpu.matmul %136, %22, %cst_73 {dimension_numbers = #tpu.dot_dimension_numbers<[1], [0], [0], [1], [0, 0, 1, 1], [], []>} : vector<1x32xbf16>, vector<32x32xbf16>, vector<1x32xf32> -> vector<1x32xf32>
    %138 = arith.addf %115, %137 : vector<1x32xf32>
    %c0_74 = arith.constant 0 : index
    %c0_75 = arith.constant 0 : index
    %139 = vector.load %arg8[%c0_74, %c0_75] : memref<1x32xf32, #tpu.memory_space<vmem>>, vector<1x32xf32>
    %140 = arith.addf %138, %139 : vector<1x32xf32>
    %141 = arith.truncf %140 : vector<1x32xf32> to vector<1x32xbf16>
    %cst_76 = arith.constant dense<0.000000e+00> : vector<1x32xf32>
    %142 = tpu.matmul %141, %24, %cst_76 {dimension_numbers = #tpu.dot_dimension_numbers<[1], [0], [0], [1], [0, 0, 1, 1], [], []>} : vector<1x32xbf16>, vector<32x32xbf16>, vector<1x32xf32> -> vector<1x32xf32>
    %c0_77 = arith.constant 0 : index
    %c0_78 = arith.constant 0 : index
    %143 = vector.load %arg10[%c0_77, %c0_78] : memref<1x32xf32, #tpu.memory_space<vmem>>, vector<1x32xf32>
    %144 = arith.addf %142, %143 : vector<1x32xf32>
    %c2_79 = arith.constant 2 : index
    %c0_80 = arith.constant 0 : index
    %145 = vector.load %arg12[%c2_79, %c0_80] : memref<4x32xf32, #tpu.memory_space<vmem>>, vector<1x32xf32>
    tpu.vector_store %arg12[%c2_79, %c0_80], %144 {strides = array<i32>} : memref<4x32xf32, #tpu.memory_space<vmem>>, vector<1x32xf32>,
    %146 = vector.extract_strided_slice %25 {offsets = [3, 0, 0], sizes = [1, 4, 32], strides = [1, 1, 1]} : vector<4x4x32xf32> to vector<1x4x32xf32>
    %147 = vector.shape_cast %146 : vector<1x4x32xf32> to vector<4x32xf32>
    %148 = arith.truncf %147 : vector<4x32xf32> to vector<4x32xbf16>
    %cst_81 = arith.constant dense<0.000000e+00> : vector<4x96xf32>
    %149 = tpu.matmul %148, %21, %cst_81 {dimension_numbers = #tpu.dot_dimension_numbers<[1], [0], [0], [1], [0, 0, 1, 1], [], []>} : vector<4x32xbf16>, vector<32x96xbf16>, vector<4x96xf32> -> vector<4x96xf32>
    %150 = vector.broadcast %23 : vector<1x96xf32> to vector<4x96xf32>
    %151 = arith.addf %149, %150 : vector<4x96xf32>
    %152 = vector.extract_strided_slice %151 {offsets = [1, 0], sizes = [1, 32], strides = [1, 1]} : vector<4x96xf32> to vector<1x32xf32>
    %153 = vector.extract_strided_slice %151 {offsets = [0, 32], sizes = [4, 32], strides = [1, 1]} : vector<4x96xf32> to vector<4x32xf32>
    %154 = vector.extract_strided_slice %151 {offsets = [0, 64], sizes = [4, 32], strides = [1, 1]} : vector<4x96xf32> to vector<4x32xf32>
    %cst_82 = arith.constant 0.000000e+00 : f32
    %155 = vector.broadcast %cst_82 : f32 to vector<1x32xf32>
    %156 = vector.broadcast %152 : vector<1x32xf32> to vector<4x32xf32>
    %157 = arith.mulf %156, %153 : vector<4x32xf32>
    %cst_83 = arith.constant dense<0.000000e+00> : vector<4xf32>
    %158 = vector.multi_reduction <add>, %157, %cst_83 [1] : vector<4x32xf32> to vector<4xf32>
    %159 = vector.shape_cast %158 : vector<4xf32> to vector<4x1xf32>
    %cst_84 = arith.constant 0.176776692 : f32
    %160 = vector.broadcast %cst_84 : f32 to vector<4x1xf32>
    %161 = arith.mulf %159, %160 : vector<4x1xf32>
    %cst_85 = arith.constant dense<0xFF800000> : vector<1xf32>
    %162 = vector.multi_reduction <maximumf>, %161, %cst_85 [0] : vector<4x1xf32> to vector<1xf32>
    %163 = vector.shape_cast %162 : vector<1xf32> to vector<1x1xf32>
    %164 = vector.broadcast %163 : vector<1x1xf32> to vector<4x1xf32>
    %165 = arith.subf %161, %164 : vector<4x1xf32>
    %166 = math.exp %165 : vector<4x1xf32>
    %cst_86 = arith.constant dense<0.000000e+00> : vector<1xf32>
    %167 = vector.multi_reduction <add>, %166, %cst_86 [0] : vector<4x1xf32> to vector<1xf32>
    %168 = vector.shape_cast %167 : vector<1xf32> to vector<1x1xf32>
    %169 = tpu.reciprocal %168 {approx = true} : vector<1x1xf32> -> vector<1x1xf32>
    %170 = vector.broadcast %169 : vector<1x1xf32> to vector<4x1xf32>
    %171 = arith.mulf %166, %170 : vector<4x1xf32>
    %172 = vector.broadcast %171 : vector<4x1xf32> to vector<4x32xf32>
    %173 = arith.mulf %172, %154 : vector<4x32xf32>
    %cst_87 = arith.constant dense<0.000000e+00> : vector<32xf32>
    %174 = vector.multi_reduction <add>, %173, %cst_87 [0] : vector<4x32xf32> to vector<32xf32>
    %175 = vector.shape_cast %174 : vector<32xf32> to vector<1x32xf32>
    %176 = arith.truncf %175 : vector<1x32xf32> to vector<1x32xbf16>
    %cst_88 = arith.constant dense<0.000000e+00> : vector<1x32xf32>
    %177 = tpu.matmul %176, %22, %cst_88 {dimension_numbers = #tpu.dot_dimension_numbers<[1], [0], [0], [1], [0, 0, 1, 1], [], []>} : vector<1x32xbf16>, vector<32x32xbf16>, vector<1x32xf32> -> vector<1x32xf32>
    %178 = arith.addf %155, %177 : vector<1x32xf32>
    %c0_89 = arith.constant 0 : index
    %c0_90 = arith.constant 0 : index
    %179 = vector.load %arg8[%c0_89, %c0_90] : memref<1x32xf32, #tpu.memory_space<vmem>>, vector<1x32xf32>
    %180 = arith.addf %178, %179 : vector<1x32xf32>
    %181 = arith.truncf %180 : vector<1x32xf32> to vector<1x32xbf16>
    %cst_91 = arith.constant dense<0.000000e+00> : vector<1x32xf32>
    %182 = tpu.matmul %181, %24, %cst_91 {dimension_numbers = #tpu.dot_dimension_numbers<[1], [0], [0], [1], [0, 0, 1, 1], [], []>} : vector<1x32xbf16>, vector<32x32xbf16>, vector<1x32xf32> -> vector<1x32xf32>
    %c0_92 = arith.constant 0 : index
    %c0_93 = arith.constant 0 : index
    %183 = vector.load %arg10[%c0_92, %c0_93] : memref<1x32xf32, #tpu.memory_space<vmem>>, vector<1x32xf32>
    %184 = arith.addf %182, %183 : vector<1x32xf32>
    %c3_94 = arith.constant 3 : index
    %c0_95 = arith.constant 0 : index
    %185 = vector.load %arg12[%c3_94, %c0_95] : memref<4x32xf32, #tpu.memory_space<vmem>>, vector<1x32xf32>
    tpu.vector_store %arg12[%c3_94, %c0_95], %184 {strides = array<i32>} : memref<4x32xf32, #tpu.memory_space<vmem>>, vector<1x32xf32>,
    return
  }
  func.func @transform_0(%arg0: i32) -> (i32, i32) {
    %c0_i32 = arith.constant 0 : i32
    %c0_i32_0 = arith.constant 0 : i32
    %c0_i32_1 = arith.constant 0 : i32
    return %c0_i32, %c0_i32_0 : i32, i32
  }
  func.func @transform_1(%arg0: i32) -> (i32, i32) {
    %c0_i32 = arith.constant 0 : i32
    %c0_i32_0 = arith.constant 0 : i32
    %c0_i32_1 = arith.constant 0 : i32
    return %c0_i32, %c0_i32_0 : i32, i32
  }
  func.func @transform_2(%arg0: i32) -> (i32, i32) {
    %c0_i32 = arith.constant 0 : i32
    %c0_i32_0 = arith.constant 0 : i32
    %c0_i32_1 = arith.constant 0 : i32
    return %c0_i32, %c0_i32_0 : i32, i32
  }
  func.func @transform_3(%arg0: i32) -> (i32, i32, i32) {
    %c0_i32 = arith.constant 0 : i32
    %c0_i32_0 = arith.constant 0 : i32
    %c0_i32_1 = arith.constant 0 : i32
    %c0_i32_2 = arith.constant 0 : i32
    return %c0_i32, %c0_i32_0, %c0_i32_1 : i32, i32, i32
  }
  func.func @transform_4(%arg0: i32) -> (i32, i32) {
    %c0_i32 = arith.constant 0 : i32
    %c0_i32_0 = arith.constant 0 : i32
    %c0_i32_1 = arith.constant 0 : i32
    return %c0_i32, %c0_i32_0 : i32, i32
  }
  func.func @transform_5(%arg0: i32) -> (i32, i32) {
    %c0_i32 = arith.constant 0 : i32
    %c0_i32_0 = arith.constant 0 : i32
    %c0_i32_1 = arith.constant 0 : i32
    return %c0_i32, %c0_i32_0 : i32, i32
  }
  func.func @transform_6(%arg0: i32) -> (i32, i32) {
    %c0_i32 = arith.constant 0 : i32
    %c0_i32_0 = arith.constant 0 : i32
    %c0_i32_1 = arith.constant 0 : i32
    return %c0_i32, %c0_i32_0 : i32, i32
  }
  func.func @transform_7(%arg0: i32) -> (i32, i32) {
    %c0_i32 = arith.constant 0 : i32
    %c0_i32_0 = arith.constant 0 : i32
    %c0_i32_1 = arith.constant 0 : i32
    return %c0_i32, %c0_i32_0 : i32, i32
  }
  func.func @transform_8(%arg0: i32) -> (i32, i32) {
    %c0_i32 = arith.constant 0 : i32
    %c0_i32_0 = arith.constant 0 : i32
    %c0_i32_1 = arith.constant 0 : i32
    return %c0_i32, %c0_i32_0 : i32, i32
  }
  func.func @transform_9(%arg0: i32) -> (i32, i32) {
    %c0_i32 = arith.constant 0 : i32
    %c0_i32_0 = arith.constant 0 : i32
    %c0_i32_1 = arith.constant 0 : i32
    return %c0_i32, %c0_i32_0 : i32, i32
  }
  func.func @transform_10(%arg0: i32) -> (i32, i32) {
    %c0_i32 = arith.constant 0 : i32
    %c0_i32_0 = arith.constant 0 : i32
    %c0_i32_1 = arith.constant 0 : i32
    return %c0_i32, %c0_i32_0 : i32, i32
  }
  func.func @transform_11(%arg0: i32) -> (i32, i32) {
    %c0_i32 = arith.constant 0 : i32
    %c0_i32_0 = arith.constant 0 : i32
    %c0_i32_1 = arith.constant 0 : i32
    return %c0_i32, %c0_i32_0 : i32, i32
  }
  func.func @transform_12(%arg0: i32) -> (i32, i32, i32) {
    %c0_i32 = arith.constant 0 : i32
    %c0_i32_0 = arith.constant 0 : i32
    %c0_i32_1 = arith.constant 0 : i32
    %c0_i32_2 = arith.constant 0 : i32
    return %c0_i32, %c0_i32_0, %c0_i32_1 : i32, i32, i32
  }
}

</mosaic_0001>

<bundles_post_ra>
// kernel: tpu_custom_call.1
= control target key start
LH: loop header
LB: loop body
LE: loop exit
PB: predicated region body
PF: predicated region fallthrough
CT: control target
= control target key end

     0   :  { %18 = vsyncpa [#allocation3], 0  ;;  %s1135_s0 = inlined_call_operand.vmem [shape: f32[16,8], index: 0, kind: input, shape index: {}]   ;;  %s1136_s1 = inlined_call_operand.vmem [shape: bf16[8,32], index: 1, kind: input, shape index: {}]   ;;  %s1137_s2 = inlined_call_operand.vmem [shape: f32[1,32], index: 2, kind: input, shape index: {}]   ;;  %s1138_s3 = inlined_call_operand.hbm [shape: f32[4,4,32], index: 3, kind: input, shape index: {}, may-alias: {3,12}]   ;;  %s1139_s4 = inlined_call_operand.vmem [shape: bf16[32,96], index: 4, kind: input, shape index: {}]   ;;  %s1140_s5 = inlined_call_operand.hbm [shape: f32[1,96], index: 5, kind: input, shape index: {}]   ;;  %s1141_s6 = inlined_call_operand.vmem [shape: bf16[32,32], index: 6, kind: input, shape index: {}]   ;;  %s1142_s7 = inlined_call_operand.hbm [shape: f32[1,32], index: 7, kind: input, shape index: {}]   ;;  %s1143_s8 = inlined_call_operand.vmem [shape: bf16[32,32], index: 8, kind: input, shape index: {}]   ;;  %s1144_s9 = inlined_call_operand.hbm [shape: f32[1,32], index: 9, kind: input, shape index: {}]   ;;  %s1145_s10 = inlined_call_operand.hbm [shape: f32[16,32], index: 10, kind: output, shape index: {0}]   ;;  %s1146_s11 = inlined_call_operand.hbm [shape: f32[4,32], index: 11, kind: output, shape index: {1}]   ;;  %s1147_s12 = inlined_call_operand.hbm [shape: f32[4,4,32], index: 12, kind: output, shape index: {2}, may-alias: {3,12}]  }
   0x1   :  { %19 = vsyncpa [#allocation6], 0 }
   0x2   :  { %20 = vsyncpa [#allocation9], 0 }
   0x3   :  { %21 = vsyncpa [#allocation4], 0  ;;  %s49_s23 = sshll.u32 %s1140_s5, 4  ;;  %s50_s23 = int_to_ptr.hbm [resolvable:$true] %s49_s23 }
   0x4   :  { %22 = vsyncpa [#allocation12], 0  ;;  %s908_s24 = smov [#allocation5]   ;;  %s33_s28 = sshll.u32 %s1138_s3, 4  ;;  %s34_s28 = int_to_ptr.hbm [resolvable:$true] %s33_s28 }
   0x5   :  { %s51_s25 = sshll.u32 %s908_s24, 4  ;;  %s909_s29 = smov [#allocation2]   ;;  %s52_s25 = int_to_ptr.vmem [resolvable:$true] %s51_s25 }
   0x6   :  { %54 = dma.hbm_to_vmem [thread:$0]  %s50_s23, 16, %s52_s25, [#allocation6]  }
   0x7   :  { %s35_s30 = sshll.u32 %s909_s29, 4  ;;  %s910_s13 = smov 64   ;;  %s36_s30 = int_to_ptr.vmem [resolvable:$true] %s35_s30 }
   0x8   :  { %s911_s14 = smov 4   ;;  %s62_s16 = sshll.u32 %s1142_s7, 4  ;;  %s63_s16 = int_to_ptr.hbm [resolvable:$true] %s62_s16 }
   0x9   :  { %41 = dma.hbm_to_vmem [thread:$0]  %s34_s28, 256, %s36_s30, [#allocation3], %s910_s13, %s910_s13, %s911_s14  }
   0xa   :  { %s912_s17 = smov [#allocation7]   ;;  %s75_s20 = sshll.u32 %s1144_s9, 4  ;;  %s76_s20 = int_to_ptr.hbm [resolvable:$true] %s75_s20 }
   0xb   :  { %s64_s18 = sshll.u32 %s912_s17, 4  ;;  %s913_s21 = smov [#allocation8]   ;;  %s65_s18 = int_to_ptr.vmem [resolvable:$true] %s64_s18 }
   0xc   :  { %67 = dma.hbm_to_vmem [thread:$0]  %s63_s16, 16, %s65_s18, [#allocation6]  }
   0xd   :  { %s77_s22 = sshll.u32 %s913_s21, 4  ;;  %s78_s22 = int_to_ptr.vmem [resolvable:$true] %s77_s22 }
   0xe   :  { %80 = dma.hbm_to_vmem [thread:$0]  %s76_s20, 16, %s78_s22, [#allocation9]  }
   0xf   :  { %898 = dma.done.wait [#allocation3], 256  }
  0x10   :  { %899 = vsyncadd [#allocation3], 4294967040 }
  0x11   :  { %900 = dma.done.wait [#allocation6], 32  }
  0x12   :  { %901 = vsyncadd [#allocation6], 4294967264 }
  0x13   :  { %902 = dma.done.wait [#allocation9], 16  }
  0x14   :  { %903 = vsyncadd [#allocation9], 4294967280  ;;  %vm110_vm0 = vcmask 1043456   ;;  %v101_v0 = vld [vmem:[%s1136_s1] sm:$0xf]  ;;  %v99_v2 = vld [vmem:[%s1135_s0 + $0x8] sm:$0xff] }
  0x15   :  { %v98_v1 = vld [vmem:[%s1135_s0] sm:$0xff]  ;;  %v112_v3 = vsel %vm110_vm0, %v101_v0, 0  ;;  %vm106_vm1 = vcmask 64512   ;;  %v152_v8 = vld [vmem:[#allocation2 + $0x8] sm:$0xf]  ;;  %vm154_vm2 = vcmask 257024  }
  0x16   :  { %v100_v4 = vpack.c.bf16 %v99_v2, %v98_v1  ;;  %121 = vmatpush.bf16.msra.mxu0 %v112_v3  ;;  %v150_v5 = vld [vmem:[#allocation2] sm:$0xf]  ;;  %v151_v6 = vld [vmem:[#allocation2 + $0x4] sm:$0xf]  ;;  %v153_v9 = vld [vmem:[#allocation2 + $0xc] sm:$0xf] }
  0x17   :  { %v710_v7 = vld [vmem:[%s1137_s2] ss:$0 sm:$0xff]  ;;  %155 = vst.msk [vmem:[#allocation13] sm:$0xf] %vm154_vm2, %v150_v5  ;;  %v914_v11 = vmov 16.0   ;;  %v1021_v13 = vld [vmem:[%s1139_s4 + $0x8] sm:$0xff] }
  0x18   :  { %156 = vst.msk [vmem:[#allocation13 + $0x4] sm:$0xf] %vm154_vm2, %v151_v6  ;;  %712 = vrcp.f32 %v914_v11  ;;  %vm130_vm3 = vcmask 261120   ;;  %209 = vmatpush.bf16.msra.mxu1 %v1021_v13  ;;  %v1028_v15 = vld [vmem:[%s1139_s4] sm:$0xff]  ;;  %vm159_vm5 = vcmask 253952   ;;  %s915_s4 = smov 96  }
  0x19   :  { %654 = vmatmul.msk.bf16.vlgmr.msra.gmra.mxu0 %vm106_vm1, %v100_v4  ;;  %157 = vst.msk [vmem:[#allocation13 + $0x8] sm:$0xf] %vm154_vm2, %v152_v8  ;;  %v1042_v39 = vld [vmem:[#allocation5] ss:$0 sm:$0xff]  ;;  %vm246_vm6 = vcmask 781824   ;;  %s606_s22 = sshll.u32 %s1145_s10, 4  ;;  %s607_s22 = int_to_ptr.hbm [resolvable:$true] %s606_s22 }
  0x1a   :  { %158 = vst.msk [vmem:[#allocation13 + $0xc] sm:$0xf] %vm154_vm2, %v153_v9  ;;  %328 = vmatpush.bf16.msrb.mxu0 %v1021_v13  ;;  %s917_s7 = smov 128   ;;  %s918_s23 = smov 8  }
  0x1b   :  { %s919_s24 = smov [#allocation11]   ;;  %s620_s27 = sshll.u32 %s1146_s11, 4  ;;  %s621_s27 = int_to_ptr.hbm [resolvable:$true] %s620_s27 }
  0x1c   :  { %210 = vmatpush.bf16.msra.mxu1 %v1028_v15  ;;  %s618_s25 = sshll.u32 %s919_s24, 4  ;;  %s920_s28 = smov [#allocation13]   ;;  %s619_s25 = int_to_ptr.vmem [resolvable:$true] %s618_s25 }
  0x1d   :  { %s628_s0 = sshll.u32 %s920_s28, 4  ;;  %s630_s10 = sshll.u32 %s1147_s12, 4  ;;  %s629_s0 = int_to_ptr.vmem [resolvable:$true] %s628_s0  ;;  %s631_s10 = int_to_ptr.hbm [resolvable:$true] %s630_s10 }
  0x1e   :  { %v713_v16 = vpop.eup %712  ;;  %329 = vmatpush.bf16.msrb.mxu0 %v1028_v15 }
  0x1f   :  { %v143_v19 = vmul.f32 16.0, %v713_v16  ;;  %vm147_vm4 = vweird.f32 %v713_v16 }
  0x21   :  { %v144_v23 = vsub.f32 1.0, %v143_v19 }
  0x23   :  { %v145_v26 = vmul.f32 %v713_v16, %v144_v23 }
  0x25   :  { %v146_v29 = vadd.f32 %v713_v16, %v145_v26 }
  0x27   :  { %v148_v32 = vsel %vm147_vm4, %v713_v16, %v146_v29 }
  0x96   :  { %v123_v10 = vpop.f32.mrf.mxu0 }
  0x97   :  { %v124_v12 = vadd.f32 %v710_v7, %v123_v10 }
  0x99   :  { %v128_v14 = vmax.f32 %v124_v12, 0.0 }
  0x9b   :  { %131 = vst.msk [vmem:[#allocation10] sm:$0xff] %vm130_vm3, %v128_v14  ;;  %v133_v21 = vsel %vm130_vm3, %v128_v14, 0.0 }
  0x9e   :  { %v125_v17 = vpop.f32.mrf.mxu0 }
  0x9f   :  { %v126_v18 = vadd.f32 %v710_v7, %v125_v17 }
  0xa1   :  { %v129_v20 = vmax.f32 %v126_v18, 0.0 }
  0xa3   :  { %132 = vst.msk [vmem:[#allocation10 + $0x8] sm:$0xff] %vm130_vm3, %v129_v20  ;;  %v134_v22 = vsel %vm130_vm3, %v129_v20, 0.0 }
  0xa4   :  { %v135_v24 = vadd.f32 %v134_v22, %v133_v21 }
  0xa6   :  { %v136_v25 = vrot.slane %v135_v24, 4 }
  0xa8   :  { %v137_v27 = vadd.f32 %v136_v25, %v135_v24 }
  0xaa   :  { %v138_v28 = vrot.slane %v137_v27, 2 }
  0xac   :  { %v139_v30 = vadd.f32 %v138_v28, %v137_v27  ;;  %v1065_v28 = vld [vmem:[%s1141_s6 + $0x8] sm:$0xff] }
  0xad   :  { %386 = vmatpush.bf16.msrb.mxu1 %v1065_v28  ;;  %280 = vmatpush.bf16.msra.mxu2 %v1065_v28 }
  0xae   :  { %v140_v31 = vrot.slane %v139_v30, 1  ;;  %480 = vmatpush.bf16.msra.mxu0 %v1065_v28 }
  0xb0   :  { %v141_v33 = vadd.f32 %v140_v31, %v139_v30  ;;  %v693_v30 = vld [vmem:[%s1141_s6] sm:$0xff] }
  0xb1   :  { %281 = vmatpush.bf16.msra.mxu2 %v693_v30  ;;  %387 = vmatpush.bf16.msrb.mxu1 %v693_v30 }
  0xb2   :  { %v149_v34 = vmul.f32 %v148_v32, %v141_v33  ;;  %481 = vmatpush.bf16.msra.mxu0 %v693_v30 }
  0xb4   :  { %160 = vst.msk [vmem:[#allocation13 + $0x1] sm:$0x1] %vm159_vm5, %v149_v34 }
  0xb5   :  { %162 = vst.msk [vmem:[#allocation13 + $0x5] sm:$0x1] %vm159_vm5, %v149_v34 }
  0xb6   :  { %164 = vst.msk [vmem:[#allocation13 + $0x9] sm:$0x1] %vm159_vm5, %v149_v34 }
  0xb7   :  { %166 = vst.msk [vmem:[#allocation13 + $0xd] sm:$0x1] %vm159_vm5, %v149_v34 }
  0xbb   :  { %v180_v35 = vld [vmem:[#allocation13] sm:$0xf] }
  0xbc   :  { %v184_v36 = vpack.c.bf16 %v180_v35, %v180_v35  ;;  %v181_v37 = vld [vmem:[#allocation13 + $0x4] sm:$0xf] }
  0xbd   :  { %v318_v38 = vpack.c.bf16 %v181_v37, %v181_v37 }
  0xbe   :  { %663 = vmatmul.msk.bf16.vlgmr.msra.gmra.mxu1 %vm130_vm3, %v184_v36 }
  0xbf   :  { %682 = vmatmul.msk.bf16.vlgmr.msrb.gmra.mxu0 %vm130_vm3, %v318_v38 }
 0x13b   :  { %v212_v40 = vpop.f32.mrf.mxu1 }
 0x13c   :  { %v1045_v41 = vadd.f32 %v1042_v39, %v212_v40  ;;  %v331_v42 = vpop.f32.mrf.mxu0 }
 0x13d   :  { %v1050_v44 = vadd.f32 %v1042_v39, %v331_v42 }
 0x13e   :  { %218 = vrot.lane.b32.xlu0 %v1045_v41, %s915_s4  ;;  %v216_v46 = vperm.slane %v1045_v41, 1 }
 0x13f   :  { %v335_v50 = vperm.slane %v1050_v44, 1 }
 0x143   :  { %v214_v43 = vpop.f32.mrf.mxu1 }
 0x144   :  { %v333_v45 = vpop.f32.mrf.mxu0 }
 0x146   :  { %337 = vrot.lane.b32.xlu0 %v1050_v44, %s915_s4 }
 0x1b0   :  { %v219_v47 = vpop.permute.xlu0 %218 }
 0x1b1   :  { %v221_v48 = vmul.f32 %v219_v47, %v216_v46 }
 0x1b3   :  { %v222_v49 = vsel %vm154_vm2, %v221_v48, 0.0 }
 0x1b4   :  { %223 = vadd.xlane.f32.xlu1 %v222_v49 }
 0x1b8   :  { %v338_v51 = vpop.permute.xlu0 %337 }
 0x1b9   :  { %v340_v52 = vmul.f32 %v338_v51, %v335_v50 }
 0x1bb   :  { %v341_v53 = vsel %vm154_vm2, %v340_v52, 0.0 }
 0x1bc   :  { %342 = vadd.xlane.f32.xlu1 %v341_v53 }
 0x227   :  { %v224_v54 = vpop.xlane.xlu1 %223 }
 0x228   :  { %v225_v55 = vmul.f32 0.17677669, %v224_v54 }
 0x22a   :  { %v226_v56 = vsel %vm110_vm0, %v225_v55, -inf }
 0x22b   :  { %v227_v57 = vrot.slane %v226_v56, 4 }
 0x22d   :  { %v228_v58 = vmax.f32 %v226_v56, %v227_v57  ;;  %v695_v56 = vld [vmem:[%s1143_s8] sm:$0xff] }
 0x22f   :  { %v229_v59 = vrot.slane %v228_v58, 2  ;;  %v343_v60 = vpop.xlane.xlu1 %342 }
 0x230   :  { %v344_v61 = vmul.f32 0.17677669, %v343_v60 }
 0x231   :  { %v230_v62 = vmax.f32 %v228_v58, %v229_v59  ;;  %v255_v59 = vld [vmem:[#allocation7] sm:$0x1] }
 0x232   :  { %v345_v63 = vsel %vm110_vm0, %v344_v61, -inf }
 0x233   :  { %v231_v0 = vrot.slane %v230_v62, 1  ;;  %v346_v1 = vrot.slane %v345_v63, 4 }
 0x235   :  { %v232_v2 = vmax.f32 %v230_v62, %v231_v0  ;;  %v347_v3 = vmax.f32 %v345_v63, %v346_v1 }
 0x237   :  { %v233_v4 = vsub.f32 %v225_v55, %v232_v2  ;;  %v348_v5 = vrot.slane %v347_v3, 2 }
 0x239   :  { %v234_v6 = vmul.f32 1.442695, %v233_v4  ;;  %v349_v7 = vmax.f32 %v347_v3, %v348_v5  ;;  %v183_v4 = vld [vmem:[#allocation13 + $0xc] sm:$0xf] }
 0x23b   :  { %714 = vpow2.f32 %v234_v6  ;;  %v350_v8 = vrot.slane %v349_v7, 1  ;;  %v506_v6 = vpack.c.bf16 %v183_v4, %v183_v4 }
 0x23d   :  { %v351_v9 = vmax.f32 %v349_v7, %v350_v8  ;;  %v288_v7 = vld [vmem:[#allocation8] sm:$0x1] }
 0x23f   :  { %v352_v10 = vsub.f32 %v344_v61, %v351_v9  ;;  %v373_v61 = vld [vmem:[#allocation7] sm:$0x1]  ;;  %v394_v9 = vld [vmem:[#allocation8] sm:$0x1] }
 0x241   :  { %v715_v11 = vpop.eup %714  ;;  %v353_v12 = vmul.f32 1.442695, %v352_v10 }
 0x242   :  { %v236_v14 = vsel %vm110_vm0, %v715_v11, 0.0 }
 0x243   :  { %v237_v16 = vrot.slane %v236_v14, 4  ;;  %716 = vpow2.f32 %v353_v12 }
 0x245   :  { %v238_v17 = vadd.f32 %v237_v16, %v236_v14 }
 0x247   :  { %v239_v18 = vrot.slane %v238_v17, 2 }
 0x249   :  { %v717_v19 = vpop.eup %716  ;;  %v240_v20 = vadd.f32 %v239_v18, %v238_v17 }
 0x24a   :  { %v355_v21 = vsel %vm110_vm0, %v717_v19, 0.0 }
 0x24b   :  { %v241_v22 = vrot.slane %v240_v20, 1  ;;  %v356_v23 = vrot.slane %v355_v21, 4 }
 0x24d   :  { %v242_v24 = vadd.f32 %v241_v22, %v240_v20  ;;  %v357_v25 = vadd.f32 %v356_v23, %v355_v21 }
 0x24f   :  { %718 = vrcp.f32 %v242_v24  ;;  %v358_v26 = vrot.slane %v357_v25, 2 }
 0x251   :  { %v359_v27 = vadd.f32 %v358_v26, %v357_v25 }
 0x253   :  { %v360_v29 = vrot.slane %v359_v27, 1 }
 0x255   :  { %v719_v31 = vpop.eup %718  ;;  %v361_v32 = vadd.f32 %v360_v29, %v359_v27 }
 0x256   :  { %v244_v33 = vmul.f32 %v719_v31, %v715_v11 }
 0x257   :  { %720 = vrcp.f32 %v361_v32 }
 0x258   :  { %v245_v34 = vmul.f32 %v244_v33, %v1045_v41 }
 0x25a   :  { %v247_v35 = vsel %vm246_vm6, %v245_v34, 0.0 }
 0x25b   :  { %v248_v36 = vrot.slane %v247_v35, 4 }
 0x25d   :  { %v721_v37 = vpop.eup %720  ;;  %v249_v38 = vadd.f32 %v248_v36, %v247_v35 }
 0x25e   :  { %v363_v40 = vmul.f32 %v721_v37, %v717_v19 }
 0x25f   :  { %v250_v42 = vrot.slane %v249_v38, 2 }
 0x260   :  { %v364_v43 = vmul.f32 %v363_v40, %v1050_v44  ;;  %v696_v44 = vld [vmem:[%s1143_s8 + $0x8] sm:$0xff]  ;;  %s916_s8 = smov [#allocation10]  }
 0x261   :  { %v251_v45 = vadd.f32 %v250_v42, %v249_v38  ;;  %404 = vmatpush.bf16.msrb.mxu2 %v696_v44  ;;  %310 = vmatpush.bf16.msra.mxu3 %v696_v44  ;;  %s604_s19 = sshll.u32 %s916_s8, 4  ;;  %s605_s19 = int_to_ptr.vmem [resolvable:$true] %s604_s19 }
 0x262   :  { %v365_v46 = vsel %vm246_vm6, %v364_v43, 0.0  ;;  %498 = vmatpush.bf16.msra.mxu1 %v696_v44  ;;  %592 = vmatpush.bf16.msrb.mxu0 %v696_v44  ;;  %612 = dma.vmem_to_hbm [thread:$0]  %s605_s19, 256, %s607_s22, [#allocation4], %s917_s7, %s917_s7, %s918_s23  }
 0x263   :  { %v252_v47 = vrot.slane %v251_v45, 1  ;;  %v366_v48 = vrot.slane %v365_v46, 4 }
 0x265   :  { %v253_v49 = vadd.f32 %v252_v47, %v251_v45  ;;  %v367_v50 = vadd.f32 %v366_v48, %v365_v46  ;;  %405 = vmatpush.bf16.msrb.mxu2 %v695_v56  ;;  %311 = vmatpush.bf16.msra.mxu3 %v695_v56 }
 0x266   :  { %499 = vmatpush.bf16.msra.mxu1 %v695_v56  ;;  %593 = vmatpush.bf16.msrb.mxu0 %v695_v56 }
 0x267   :  { %v254_v51 = vpack.c.bf16 %v253_v49, %v253_v49  ;;  %v368_v52 = vrot.slane %v367_v50, 2 }
 0x269   :  { %257 = vrot.lane.b32.xlu2 %v254_v51, %s910_s13  ;;  %v369_v41 = vadd.f32 %v368_v52, %v367_v50  ;;  %422 = vmatpush.bf16.msrb.mxu3 %v1021_v13 }
 0x26b   :  { %v370_v53 = vrot.slane %v369_v41, 1 }
 0x26d   :  { %v371_v54 = vadd.f32 %v370_v53, %v369_v41  ;;  %423 = vmatpush.bf16.msrb.mxu3 %v1028_v15 }
 0x26f   :  { %v372_v55 = vpack.c.bf16 %v371_v54, %v371_v54 }
 0x271   :  { %375 = vrot.lane.b32.xlu2 %v372_v55, %s910_s13 }
 0x2c3   :  { %v258_v57 = vpop.permute.xlu2 %257 }
 0x2c4   :  { %672 = vmatmul.msk.bf16.vlgmr.msra.gmra.mxu2 %vm130_vm3, %v258_v57 }
 0x2c5   :  { %516 = vmatpush.bf16.msra.mxu2 %v1021_v13 }
 0x2c9   :  { %517 = vmatpush.bf16.msra.mxu2 %v1028_v15  ;;  %v182_v15 = vld [vmem:[#allocation13 + $0x8] sm:$0xf] }
 0x2ca   :  { %v412_v5 = vpack.c.bf16 %v182_v15, %v182_v15 }
 0x2cb   :  { %v376_v58 = vpop.permute.xlu2 %375 }
 0x2cc   :  { %683 = vmatmul.msk.bf16.vlgmr.msrb.gmra.mxu1 %vm130_vm3, %v376_v58 }
 0x347   :  { %v283_v60 = vpop.f32.mrf.mxu2 }
 0x348   :  { %v284_v62 = vadd.f32 %v283_v60, %v255_v59 }
 0x349   :  { %v389_v63 = vpop.f32.mrf.mxu1 }
 0x34a   :  { %v287_v0 = vpack.c.bf16 %v284_v62, %v284_v62  ;;  %v390_v1 = vadd.f32 %v389_v63, %v373_v61 }
 0x34c   :  { %v393_v2 = vpack.c.bf16 %v390_v1, %v390_v1  ;;  %681 = vmatmul.msk.bf16.vlgmr.msra.gmra.mxu3 %vm130_vm3, %v287_v0 }
 0x34d   :  { %574 = vmatpush.bf16.msra.mxu3 %v1065_v28 }
 0x34e   :  { %684 = vmatmul.msk.bf16.vlgmr.msrb.gmra.mxu2 %vm130_vm3, %v393_v2 }
 0x34f   :  { %v285_v13 = vpop.f32.mrf.mxu2 }
 0x351   :  { %v391_v3 = vpop.f32.mrf.mxu1  ;;  %575 = vmatpush.bf16.msra.mxu3 %v693_v30 }
 0x35c   :  { %685 = vmatmul.msk.bf16.vlgmr.msrb.gmra.mxu3 %vm130_vm3, %v412_v5 }
 0x35e   :  { %688 = vmatmul.msk.bf16.vlgmr.msra.gmra.mxu2 %vm130_vm3, %v506_v6 }
 0x3cf   :  { %v313_v8 = vpop.f32.mrf.mxu3 }
 0x3d0   :  { %v314_v10 = vadd.f32 %v313_v8, %v288_v7 }
 0x3d1   :  { %v407_v11 = vpop.f32.mrf.mxu2 }
 0x3d2   :  { %317 = vst.msk [vmem:[#allocation11] sm:$0x1] %vm159_vm5, %v314_v10  ;;  %v408_v12 = vadd.f32 %v407_v11, %v394_v9 }
 0x3d4   :  { %411 = vst.msk [vmem:[#allocation11 + $0x1] sm:$0x1] %vm159_vm5, %v408_v12 }
 0x3d7   :  { %v315_v14 = vpop.f32.mrf.mxu3 }
 0x3d9   :  { %v409_v16 = vpop.f32.mrf.mxu2 }
 0x3df   :  { %v425_v17 = vpop.f32.mrf.mxu3 }
 0x3e0   :  { %v1099_v18 = vadd.f32 %v1042_v39, %v425_v17 }
 0x3e1   :  { %v519_v19 = vpop.f32.mrf.mxu2 }
 0x3e2   :  { %v520_v20 = vadd.f32 %v1042_v39, %v519_v19  ;;  %431 = vrot.lane.b32.xlu1 %v1099_v18, %s915_s4  ;;  %v429_v23 = vperm.slane %v1099_v18, 1 }
 0x3e4   :  { %525 = vrot.lane.b32.xlu0 %v520_v20, %s915_s4  ;;  %v523_v26 = vperm.slane %v520_v20, 1 }
 0x3e7   :  { %v427_v21 = vpop.f32.mrf.mxu3 }
 0x3e9   :  { %v521_v22 = vpop.f32.mrf.mxu2 }
 0x454   :  { %v432_v24 = vpop.permute.xlu1 %431 }
 0x455   :  { %v434_v25 = vmul.f32 %v432_v24, %v429_v23 }
 0x456   :  { %v526_v27 = vpop.permute.xlu0 %525 }
 0x457   :  { %v528_v28 = vmul.f32 %v526_v27, %v523_v26  ;;  %v435_v29 = vsel %vm154_vm2, %v434_v25, 0.0 }
 0x458   :  { %436 = vadd.xlane.f32.xlu0 %v435_v29  ;;  %v561_v29 = vld [vmem:[#allocation7] sm:$0x1] }
 0x459   :  { %v529_v30 = vsel %vm154_vm2, %v528_v28, 0.0 }
 0x45a   :  { %530 = vadd.xlane.f32.xlu2 %v529_v30 }
 0x4cb   :  { %v437_v39 = vpop.xlane.xlu0 %436 }
 0x4cc   :  { %v438_v31 = vmul.f32 0.17677669, %v437_v39  ;;  %v467_v39 = vld [vmem:[#allocation7] sm:$0x1] }
 0x4cd   :  { %v531_v32 = vpop.xlane.xlu2 %530 }
 0x4ce   :  { %v439_v33 = vsel %vm110_vm0, %v438_v31, -inf  ;;  %v532_v34 = vmul.f32 0.17677669, %v531_v32 }
 0x4cf   :  { %v440_v35 = vrot.slane %v439_v33, 4 }
 0x4d0   :  { %v533_v36 = vsel %vm110_vm0, %v532_v34, -inf }
 0x4d1   :  { %v441_v37 = vmax.f32 %v439_v33, %v440_v35  ;;  %v534_v38 = vrot.slane %v533_v36, 4 }
 0x4d3   :  { %v442_v40 = vrot.slane %v441_v37, 2  ;;  %v535_v42 = vmax.f32 %v533_v36, %v534_v38  ;;  %v582_v38 = vld [vmem:[#allocation8] sm:$0x1] }
 0x4d5   :  { %v443_v43 = vmax.f32 %v441_v37, %v442_v40  ;;  %v536_v45 = vrot.slane %v535_v42, 2 }
 0x4d7   :  { %v444_v46 = vrot.slane %v443_v43, 1  ;;  %v537_v47 = vmax.f32 %v535_v42, %v536_v45  ;;  %v488_v42 = vld [vmem:[#allocation8] sm:$0x1] }
 0x4d9   :  { %v445_v48 = vmax.f32 %v443_v43, %v444_v46  ;;  %v538_v49 = vrot.slane %v537_v47, 1 }
 0x4db   :  { %v446_v50 = vsub.f32 %v438_v31, %v445_v48  ;;  %v539_v51 = vmax.f32 %v537_v47, %v538_v49 }
 0x4dd   :  { %v447_v52 = vmul.f32 1.442695, %v446_v50  ;;  %v540_v41 = vsub.f32 %v532_v34, %v539_v51 }
 0x4df   :  { %722 = vpow2.f32 %v447_v52  ;;  %v541_v53 = vmul.f32 1.442695, %v540_v41 }
 0x4e1   :  { %724 = vpow2.f32 %v541_v53 }
 0x4e5   :  { %v723_v54 = vpop.eup %722 }
 0x4e6   :  { %v449_v55 = vsel %vm110_vm0, %v723_v54, 0.0 }
 0x4e7   :  { %v725_v44 = vpop.eup %724  ;;  %v450_v56 = vrot.slane %v449_v55, 4 }
 0x4e8   :  { %v543_v57 = vsel %vm110_vm0, %v725_v44, 0.0 }
 0x4e9   :  { %v451_v58 = vadd.f32 %v450_v56, %v449_v55  ;;  %v544_v59 = vrot.slane %v543_v57, 4 }
 0x4eb   :  { %v452_v60 = vrot.slane %v451_v58, 2  ;;  %v545_v61 = vadd.f32 %v544_v59, %v543_v57 }
 0x4ed   :  { %v453_v62 = vadd.f32 %v452_v60, %v451_v58  ;;  %v546_v63 = vrot.slane %v545_v61, 2 }
 0x4ef   :  { %v454_v0 = vrot.slane %v453_v62, 1  ;;  %v547_v1 = vadd.f32 %v546_v63, %v545_v61 }
 0x4f1   :  { %v455_v2 = vadd.f32 %v454_v0, %v453_v62  ;;  %v548_v13 = vrot.slane %v547_v1, 1 }
 0x4f3   :  { %726 = vrcp.f32 %v455_v2  ;;  %v549_v3 = vadd.f32 %v548_v13, %v547_v1 }
 0x4f5   :  { %728 = vrcp.f32 %v549_v3 }
 0x4f9   :  { %v727_v15 = vpop.eup %726 }
 0x4fa   :  { %v457_v4 = vmul.f32 %v727_v15, %v723_v54 }
 0x4fb   :  { %v729_v5 = vpop.eup %728 }
 0x4fc   :  { %v551_v6 = vmul.f32 %v729_v5, %v725_v44  ;;  %v458_v7 = vmul.f32 %v457_v4, %v1099_v18 }
 0x4fe   :  { %v552_v8 = vmul.f32 %v551_v6, %v520_v20  ;;  %v459_v9 = vsel %vm246_vm6, %v458_v7, 0.0 }
 0x4ff   :  { %v460_v10 = vrot.slane %v459_v9, 4 }
 0x500   :  { %v553_v11 = vsel %vm246_vm6, %v552_v8, 0.0 }
 0x501   :  { %v554_v12 = vrot.slane %v553_v11, 4  ;;  %v461_v14 = vadd.f32 %v460_v10, %v459_v9 }
 0x503   :  { %v555_v16 = vadd.f32 %v554_v12, %v553_v11  ;;  %v462_v19 = vrot.slane %v461_v14, 2 }
 0x505   :  { %v556_v17 = vrot.slane %v555_v16, 2  ;;  %v463_v23 = vadd.f32 %v462_v19, %v461_v14 }
 0x507   :  { %v557_v21 = vadd.f32 %v556_v17, %v555_v16  ;;  %v464_v26 = vrot.slane %v463_v23, 1 }
 0x509   :  { %v558_v22 = vrot.slane %v557_v21, 1  ;;  %v465_v18 = vadd.f32 %v464_v26, %v463_v23 }
 0x50b   :  { %v559_v24 = vadd.f32 %v558_v22, %v557_v21  ;;  %v466_v20 = vpack.c.bf16 %v465_v18, %v465_v18 }
 0x50d   :  { %v560_v25 = vpack.c.bf16 %v559_v24, %v559_v24 }
 0x50f   :  { %563 = vrot.lane.b32.xlu1 %v560_v25, %s910_s13 }
 0x517   :  { %469 = vrot.lane.b32.xlu1 %v466_v20, %s910_s13 }
 0x581   :  { %v564_v27 = vpop.permute.xlu1 %563 }
 0x582   :  { %689 = vmatmul.msk.bf16.vlgmr.msra.gmra.mxu3 %vm130_vm3, %v564_v27 }
 0x589   :  { %v470_v28 = vpop.permute.xlu1 %469 }
 0x58a   :  { %686 = vmatmul.msk.bf16.vlgmr.msra.gmra.mxu0 %vm130_vm3, %v470_v28 }
 0x605   :  { %v577_v30 = vpop.f32.mrf.mxu3 }
 0x606   :  { %v578_v31 = vadd.f32 %v577_v30, %v561_v29 }
 0x607   :  { %v483_v32 = vpop.f32.mrf.mxu0 }
 0x608   :  { %v581_v33 = vpack.c.bf16 %v578_v31, %v578_v31  ;;  %v484_v34 = vadd.f32 %v483_v32, %v467_v39 }
 0x60a   :  { %v487_v35 = vpack.c.bf16 %v484_v34, %v484_v34  ;;  %690 = vmatmul.msk.bf16.vlgmr.msrb.gmra.mxu0 %vm130_vm3, %v581_v33 }
 0x60c   :  { %687 = vmatmul.msk.bf16.vlgmr.msra.gmra.mxu1 %vm130_vm3, %v487_v35 }
 0x60d   :  { %v579_v36 = vpop.f32.mrf.mxu3 }
 0x60f   :  { %v485_v37 = vpop.f32.mrf.mxu0 }
 0x687   :  { %v595_v40 = vpop.f32.mrf.mxu0 }
 0x688   :  { %v596_v43 = vadd.f32 %v595_v40, %v582_v38 }
 0x689   :  { %v501_v45 = vpop.f32.mrf.mxu1 }
 0x68a   :  { %599 = vst.msk [vmem:[#allocation11 + $0x3] sm:$0x1] %vm159_vm5, %v596_v43  ;;  %v502_v46 = vadd.f32 %v501_v45, %v488_v42 }
 0x68c   :  { %505 = vst.msk [vmem:[#allocation11 + $0x2] sm:$0x1] %vm159_vm5, %v502_v46 }
 0x68d   :  { %623 = dma.vmem_to_hbm [thread:$0]  %s619_s25, 64, %s621_s27, [#allocation12]  }
 0x68e   :  { %636 = dma.vmem_to_hbm [thread:$0]  %s629_s0, 256, %s631_s10, [#allocation12], %s910_s13, %s910_s13, %s911_s14  }
 0x68f   :  { %v597_v47 = vpop.f32.mrf.mxu0 }
 0x691   :  { %v503_v48 = vpop.f32.mrf.mxu1 }
 0x692   :  { %904 = dma.done.wait [#allocation4], 256  }
 0x693   :  { %905 = vsyncadd [#allocation4], 4294967040 }
 0x694   :  { %906 = dma.done.wait [#allocation12], 320  }
 0x695   :  { %907 = vsyncadd [#allocation12], 4294966976 }
 0x696   :  { %649 = vsyncpa [#allocation3], 1 }
 0x697   :  { %650 = vsyncpa [#allocation6], 1 }
 0x698   :  { %651 = vsyncpa [#allocation9], 1 }
 0x699   :  { %652 = vsyncpa [#allocation4], 1 }
 0x69a   :  { %653 = vsyncpa [#allocation12], 1 }

</bundles_post_ra>
